<compile_context>
chip_gen: v7x
topology: tpu7x:2x2x1
jax: 0.10.0
libtpu: 0.0.40
codegen_flags: <defaults>
</compile_context>

<pallas_src>
import math

import jax
import jax.numpy as jnp
from jax.experimental import pallas as pl
from jax.experimental.pallas import tpu as pltpu


def _round_up(n: int, m: int) -> int:
    return ((n + m - 1) // m) * m


def _round_down(n: int, m: int) -> int:
    return (n // m) * m


# dtype-native sublane multiple (sub-32-bit dtypes pack along sublanes).
_SUBLANE_BY_ITEMSIZE = {1: 32, 2: 16, 4: 8}


def add_pe_kernel(x_ref, pe_ref, o_ref):
    # x_ref:  (tb, tc) tile of the (batch, seq*d_model) slab
    # pe_ref: (1, tc)  matching slice of the positional table (broadcast over rows)
    # Dropout in eval mode is the identity.
    o_ref[...] = (x_ref[...] + pe_ref[...]).astype(o_ref.dtype)


def make_positional_encoding(seq_len: int, d_model: int, dtype=jnp.float32):
    """Same table as the PyTorch module's __init__ (sin on even, cos on odd cols)."""
    assert d_model % 2 == 0, "d_model must be even (as in the PyTorch module)"
    position = jnp.arange(seq_len, dtype=jnp.float32)[:, None]              # (S, 1)
    div_term = jnp.exp(
        jnp.arange(0, d_model, 2, dtype=jnp.float32) * (-math.log(10000.0) / d_model)
    )                                                                        # (D/2,)
    angles = position * div_term                                             # (S, D/2)
    pe = jnp.zeros((seq_len, d_model), jnp.float32)
    pe = pe.at[:, 0::2].set(jnp.sin(angles))
    pe = pe.at[:, 1::2].set(jnp.cos(angles))
    return pe.astype(dtype)


def positional_encoding(x, pe, *, target_tile_bytes=2 << 20):
    """x: (B, S, D); pe: (seq_len, D) with seq_len >= S.

    Returns x + pe[None, :S, :] (eval-mode dropout == identity).
    `target_tile_bytes` is the per-step x-tile byte budget (~2 MiB default;
    raise to 4-8 MiB on v7x, keep <= ~3 MiB on v5e).
    """
    B, S, D = x.shape
    L = S * D
    x2 = x.reshape(B, L)              # lane-dense slab; reshape of contiguous data is free
    pe2 = pe[:S].reshape(1, L)

    itemsize = jnp.dtype(x.dtype).itemsize
    sublane = _SUBLANE_BY_ITEMSIZE.get(itemsize, 8)

    # Row (sublane) tile: whole batch (capped), dtype-native sublane aligned.
    tb = _round_up(min(B, 512), sublane)
    # Column (lane) tile: byte-budgeted so the per-step payload stays near the
    # HBM roofline regardless of batch size; multiple of 128 lanes.
    L_lanes = _round_up(L, 128)
    tc_budget = max(128, _round_down(target_tile_bytes // (tb * itemsize), 128))
    tc = min(L_lanes, tc_budget)

    grid_rows = pl.cdiv(B, tb)
    grid_cols = pl.cdiv(L, tc)

    # If the grid collapses to one step and the payload is substantial, split
    # the ROW axis (keeps full-width, unmasked lane-dense stores) so both
    # TensorCores on multi-core chips (v7x) get work.  For tiny payloads the
    # extra ~0.35 us grid step would be pure overhead, so skip it.
    if grid_rows == 1 and grid_cols == 1:
        payload_bytes = B * L * itemsize
        if payload_bytes >= (2 << 20) and tb >= 2 * sublane:
            tb = _round_up(pl.cdiv(B, 2), sublane)
            grid_rows = pl.cdiv(B, tb)

    # Column axis OUTER -> the pe tile index (0, j) is constant across the
    # inner row loop, so the pe slice stays resident in VMEM.
    grid = (grid_cols, grid_rows)

    out = pl.pallas_call(
        add_pe_kernel,
        out_shape=jax.ShapeDtypeStruct((B, L), x.dtype),
        grid_spec=pltpu.PrefetchScalarGridSpec(
            num_scalar_prefetch=0,
            grid=grid,
            in_specs=[
                pl.BlockSpec((tb, tc), lambda j, i: (i, j)),   # x tile
                pl.BlockSpec((1, tc), lambda j, i: (0, j)),    # pe tile (row-broadcast)
            ],
            out_specs=pl.BlockSpec((tb, tc), lambda j, i: (i, j)),
        ),
        compiler_params=pltpu.CompilerParams(
            dimension_semantics=("parallel", "parallel"),
            # 32 MiB is >= the scoped default and <= physical VMEM on
            # v5e/v6e/v7x; leaves room for larger target_tile_bytes on v7x.
            vmem_limit_bytes=32 * 1024 * 1024,
        ),
    )(x2, pe2)

    return out.reshape(B, S, D)


def reference(x, pe):
    return x + pe[None, : x.shape[1], :]


if __name__ == "__main__":
    batch, seq_len, d_model = 2, 8, 32
    dropout_rate = 0.1  # nn.Dropout in eval mode -> identity

    key = jax.random.PRNGKey(0)
    x = jax.random.normal(key, (batch, seq_len, d_model), dtype=jnp.float32)

    pe = make_positional_encoding(seq_len, d_model, dtype=jnp.float32)

    out = positional_encoding(x, pe)
    out = jax.block_until_ready(out)

    ref = reference(x, pe)
    assert out.shape == (batch, seq_len, d_model)
    assert jnp.allclose(out, ref, atol=1e-6, rtol=1e-6), "mismatch vs reference"

    print("KERNEL_OK")
</pallas_src>

<mosaic_0001>
module attributes {stable_mosaic.version = 11 : i64} {
  func.func @add_pe_kernel(%arg0: i32, %arg1: i32, %arg2: memref<8x256xf32, #tpu.memory_space<vmem>>, %arg3: memref<1x256xf32, #tpu.memory_space<vmem>>, %arg4: memref<8x256xf32, #tpu.memory_space<vmem>>) attributes {dimension_semantics = [#tpu.dimension_semantics<parallel>, #tpu.dimension_semantics<parallel>], iteration_bounds = array<i64: 1, 1>, scalar_prefetch = 0 : i64, scratch_operands = 0 : i64, tpu.core_type = #tpu.core_type<tc>, window_params = [{transform_indices = @transform_0, window_bounds = array<i64: 8, 256>}, {transform_indices = @transform_1, window_bounds = array<i64: 1, 256>}, {transform_indices = @transform_2, window_bounds = array<i64: 8, 256>}]} {
    %c0 = arith.constant 0 : index
    %c0_0 = arith.constant 0 : index
    %0 = vector.load %arg2[%c0, %c0_0] : memref<8x256xf32, #tpu.memory_space<vmem>>, vector<8x256xf32>
    %c0_1 = arith.constant 0 : index
    %c0_2 = arith.constant 0 : index
    %1 = vector.load %arg3[%c0_1, %c0_2] : memref<1x256xf32, #tpu.memory_space<vmem>>, vector<1x256xf32>
    %2 = vector.broadcast %1 : vector<1x256xf32> to vector<8x256xf32>
    %3 = arith.addf %0, %2 : vector<8x256xf32>
    %c0_3 = arith.constant 0 : index
    %c0_4 = arith.constant 0 : index
    %4 = vector.load %arg4[%c0_3, %c0_4] : memref<8x256xf32, #tpu.memory_space<vmem>>, vector<8x256xf32>
    tpu.vector_store %arg4[%c0_3, %c0_4], %3 {strides = array<i32>} : memref<8x256xf32, #tpu.memory_space<vmem>>, vector<8x256xf32>,
    return
  }
  func.func @transform_0(%arg0: i32, %arg1: i32) -> (i32, i32) {
    %c0_i32 = arith.constant 0 : i32
    return %arg1, %arg0 : i32, i32
  }
  func.func @transform_1(%arg0: i32, %arg1: i32) -> (i32, i32) {
    %c0_i32 = arith.constant 0 : i32
    %c0_i32_0 = arith.constant 0 : i32
    return %c0_i32, %arg0 : i32, i32
  }
  func.func @transform_2(%arg0: i32, %arg1: i32) -> (i32, i32) {
    %c0_i32 = arith.constant 0 : i32
    return %arg1, %arg0 : i32, i32
  }
}

</mosaic_0001>

<bundles_post_ra>
// kernel: tpu_custom_call.1
= control target key start
LH: loop header
LB: loop body
LE: loop exit
PB: predicated region body
PF: predicated region fallthrough
CT: control target
= control target key end

     0   :  { %7 = vsyncpa [#allocation3], 0  ;;  %s193_s0 = inlined_call_operand.hbm [shape: f32[2,256], index: 0, kind: input, shape index: {}]   ;;  %s194_s1 = inlined_call_operand.vmem [shape: f32[1,256], index: 1, kind: input, shape index: {}]   ;;  %s195_s2 = inlined_call_operand.hbm [shape: f32[2,256], index: 2, kind: output, shape index: {}]  }
   0x1   :  { %8 = vsyncpa [#allocation4], 0 }
   0x2   :  { %13 = vsyncadd [#allocation3], 192  ;;  %s140_s9 = smov [#allocation2]   ;;  %s92_s13 = scalar_lea.hbm %s193_s0, 64 }
   0x3   :  { %s14_s10 = sshll.u32 %s140_s9, 4  ;;  %p93_p0 = scmp.ne.s32.totalorder %s193_s0, %s92_s13  ;;  %s15_s10 = int_to_ptr.vmem [resolvable:$true] %s14_s10 }
   0x4   :  { %p96_p1 = scmp.lt.u32.totalorder %s92_s13, %s193_s0 }
   0x6   :  { %p98_p2 = pnand %p96_p1, %p93_p0 }
   0x8   :  { %101 = shalt.err (!%p98_p2)
}
   0x9   :  { %s102_s18 = scalar_lea.vmem %s15_s10, 64  ;;  %s106_s19 = scalar_lea.vmem %s15_s10, 256 }
   0xa   :  { %p103_p3 = scmp.ne.s32.totalorder %s15_s10, %s102_s18  ;;  %p107_p4 = scmp.lt.s32.totalorder %s15_s10, %s15_s10 }
   0xb   :  { %p108_p5 = scmp.lt.s32.totalorder %s106_s19, %s102_s18 }
   0xd   :  { %p109_p6 = por %p108_p5, %p107_p4 }
   0xf   :  { %p110_p7 = pnand %p109_p6, %p103_p3 }
  0x11   :  { %113 = shalt.err (!%p110_p7)
}
  0x12   :  { %s141_s20 = smov 64   ;;  %s142_s21 = smov 4  }
  0x13   :  { %20 = dma.hbm_to_vmem [thread:$0]  %s193_s0, 64, %s15_s10, [#allocation3], %s141_s20, %s141_s20, %s142_s21  }
  0x14   :  { %136 = dma.done.wait [#allocation3], 256  }
  0x15   :  { %137 = vsyncadd [#allocation3], 4294967040  ;;  %v32_v0 = vlaneseq  ;;  %v143_v1 = vmov 1983009808   ;;  %v30_v7 = vld [vmem:[%s194_s1] sm:$0x3] }
  0x16   :  { %v43_v2 = vunpack.c.l.s4 %v143_v1  ;;  %v26_v13 = vld [vmem:[#allocation2] sm:$0xf]  ;;  %v28_v14 = vld [vmem:[#allocation2 + $0x8] sm:$0xf]  ;;  %v27_v17 = vld [vmem:[#allocation2 + $0x4] sm:$0xf] }
  0x17   :  { %v33_v3 = vshrl.u32 %v32_v0, 7  ;;  %v29_v18 = vld [vmem:[#allocation2 + $0xc] sm:$0xf] }
  0x18   :  { %v44_v6 = vunpack.c.0.s8 %v43_v2 }
  0x19   :  { %v34_v4 = vsub.s32 0, %v33_v3  ;;  %v38_v5 = vsub.s32 1, %v33_v3 }
  0x1a   :  { %v47_v10 = vsub.s32 %v44_v6, %v33_v3 }
  0x1b   :  { %v35_v8 = vrot.slane %v30_v7, %v34_v4  ;;  %v39_v9 = vrot.slane %v30_v7, %v38_v5 }
  0x1d   :  { %v40_v11 = vcombine.low %v35_v8, %v39_v9  ;;  %v41_v12 = vcombine.high %v35_v8, %v39_v9 }
  0x1f   :  { %v48_v15 = vrot.slane %v40_v11, %v47_v10  ;;  %v55_v16 = vrot.slane %v41_v12, %v47_v10 }
  0x21   :  { %v62_v19 = vadd.f32 %v48_v15, %v26_v13  ;;  %v56_v20 = vcombine.high %v48_v15, %v48_v15  ;;  %v64_v21 = vadd.f32 %v55_v16, %v28_v14  ;;  %v57_v22 = vcombine.high %v55_v16, %v55_v16 }
  0x23   :  { %66 = vst [vmem:[#allocation5] sm:$0xf] %v62_v19  ;;  %v63_v23 = vadd.f32 %v56_v20, %v27_v17  ;;  %68 = vst [vmem:[#allocation5 + $0x8] sm:$0xf] %v64_v21  ;;  %v65_v24 = vadd.f32 %v57_v22, %v29_v18 }
  0x25   :  { %67 = vst [vmem:[#allocation5 + $0x4] sm:$0xf] %v63_v23  ;;  %69 = vst [vmem:[#allocation5 + $0xc] sm:$0xf] %v65_v24 }
  0x26   :  { %74 = vsyncadd [#allocation4], 192  ;;  %s144_s0 = smov [#allocation5]  }
  0x27   :  { %s75_s1 = sshll.u32 %s144_s0, 4  ;;  %s76_s1 = int_to_ptr.vmem [resolvable:$true] %s75_s1 }
  0x28   :  { %s114_s26 = scalar_lea.vmem %s76_s1, 64  ;;  %s118_s27 = scalar_lea.vmem %s76_s1, 256 }
  0x29   :  { %p115_p8 = scmp.ne.s32.totalorder %s76_s1, %s114_s26  ;;  %p119_p9 = scmp.lt.s32.totalorder %s76_s1, %s76_s1 }
  0x2a   :  { %p120_p10 = scmp.lt.s32.totalorder %s118_s27, %s114_s26 }
  0x2c   :  { %p121_p11 = por %p120_p10, %p119_p9 }
  0x2e   :  { %p122_p12 = pnand %p121_p11, %p115_p8 }
  0x30   :  { %125 = shalt.err (!%p122_p12)
}
  0x31   :  { %s126_s30 = scalar_lea.hbm %s195_s2, 64 }
  0x32   :  { %p127_p13 = scmp.ne.s32.totalorder %s195_s2, %s126_s30  ;;  %p130_p0 = scmp.lt.u32.totalorder %s126_s30, %s195_s2 }
  0x34   :  { %p132_p1 = pnand %p130_p0, %p127_p13 }
  0x36   :  { %135 = shalt.err (!%p132_p1)
}
  0x37   :  { %81 = dma.vmem_to_hbm [thread:$0]  %s76_s1, 64, %s195_s2, [#allocation4], %s141_s20, %s141_s20, %s142_s21  }
  0x38   :  { %138 = dma.done.wait [#allocation4], 256  }
  0x39   :  { %139 = vsyncadd [#allocation4], 4294967040 }
  0x3a   :  { %85 = vsyncpa [#allocation3], 1 }
  0x3b   :  { %86 = vsyncpa [#allocation4], 1 }

</bundles_post_ra>
